<compile_context>
chip_gen: v6e
topology: v6e:2x2x1
jax: 0.10.0
libtpu: 0.0.40
codegen_flags: <defaults>
</compile_context>

<pallas_src>
import math

import jax
import jax.numpy as jnp
from jax import lax
from jax.experimental import pallas as pl
from jax.experimental.pallas import tpu as pltpu


def _round_up(x, m):
    return ((x + m - 1) // m) * m


def _linear_kernel(x_ref, w_ref, b_ref, o_ref):
    """o[0, 0, t] = sum_d w[0, d] * x[t, d] + b   (MXU dot, f32 accumulation).

    x_ref: (TB, D)    VMEM  batch tile (streamed / double-buffered)
    w_ref: (8,  D)    VMEM  weight row replicated to 8 sublanes (resident)
    b_ref: (1,)       SMEM  scalar bias (f32)
    o_ref: (1, 1, TB) VMEM  lane-dense output tile
    """
    # W @ x^T on the MXU: contract both operands' last axis.  Inputs stay in
    # their native dtype (bf16 is NOT upcast); accumulation is f32.
    acc = lax.dot_general(
        w_ref[...], x_ref[...],
        dimension_numbers=(((1,), (1,)), ((), ())),
        preferred_element_type=jnp.float32,
    )                                               # (8, TB) f32, lane-dense
    res = acc[0:1, :] + b_ref[0]                    # row 0 is the real result
    o_ref[...] = res.astype(o_ref.dtype)[None]      # (1, 1, TB) unmasked store


def linear_classifier(x, weight, bias, *, block_batch=None):
    """Pallas forward for nn.Linear(input_dim, 1): y = x @ W.T + b.

    Args:
      x:      (batch, input_dim)
      weight: (1, input_dim)   PyTorch nn.Linear layout
      bias:   (1,)
    Returns:
      (batch, 1), same dtype as x.
    """
    B, D = x.shape
    out_dtype = x.dtype
    itemsize = jnp.dtype(x.dtype).itemsize
    sublane = max(8, 32 // itemsize)            # 8 f32 / 16 bf16 / 32 int8
    d_pad = _round_up(D, 128)                   # lane-padded feature dim

    # --- per-generation VMEM budget --------------------------------------
    vmem_cap = 64 * 1024 * 1024                 # conservative default (v7x)
    try:
        info = pltpu.get_tpu_info()
        cap = getattr(info, "vmem_capacity_bytes", None)
        if cap:
            vmem_cap = int(cap)
    except Exception:
        pass
    big_vmem = vmem_cap >= 100 * 1024 * 1024    # 128-MiB-VMEM v5e / v6e
    per_buffer_budget = (16 if big_vmem else 8) * 1024 * 1024
    vmem_clamp = (64 if big_vmem else 32) * 1024 * 1024

    # --- batch tile (padded-layout sizing, lane/sublane aligned) ---------
    if block_batch is None:
        lane_align = 128 if B >= 128 else sublane
        tb = per_buffer_budget // max(d_pad * itemsize, 1)
        tb = min(tb, B)
        if B >= 2 * lane_align:
            # Keep >= 2 grid steps so v7x's second TensorCore gets work
            # (one extra ~0.35 us step on single-TC v5e/v6e: negligible).
            tb = min(tb, _round_up(pl.cdiv(B, 2), lane_align))
        if B <= lane_align:
            tb = B                              # single full-array tile
        else:
            tb = max(lane_align, (tb // lane_align) * lane_align)
        block_batch = tb
    TB = block_batch

    grid_steps = pl.cdiv(B, TB)

    # --- VMEM accounting (padded sizes, double-buffered) -----------------
    x_buf = TB * d_pad * itemsize
    w_buf = 8 * d_pad * itemsize
    o_buf = 8 * _round_up(TB, 128) * jnp.dtype(out_dtype).itemsize
    vmem_limit = min(max(2 * (x_buf + w_buf + o_buf) + (2 << 20), 16 << 20),
                     vmem_clamp)

    # Tiny weight prep in the wrapper: cast to x.dtype (no upcast in-kernel)
    # and replicate the single row to 8 sublanes for a tile-aligned MXU LHS.
    w8 = jnp.broadcast_to(weight.astype(x.dtype), (8, D))
    bias_s = bias.reshape(1).astype(jnp.float32)

    # TODO(synk): sweep pipeline_mode=pl.Buffered(3) on the x BlockSpec if a
    # trace shows exposed DMA gaps at grid-step boundaries.
    out = pl.pallas_call(
        _linear_kernel,
        out_shape=jax.ShapeDtypeStruct((grid_steps, 1, TB), out_dtype),
        grid=(grid_steps,),
        in_specs=[
            pl.BlockSpec((TB, D), lambda i: (i, 0)),             # x: streamed
            pl.BlockSpec((8, D), lambda i: (0, 0)),              # weight: resident
            pl.BlockSpec(memory_space=pltpu.MemorySpace.SMEM),   # bias scalar
        ],
        out_specs=pl.BlockSpec((1, 1, TB), lambda i: (i, 0, 0)),  # lane-dense slab
        compiler_params=pltpu.CompilerParams(
            dimension_semantics=("parallel",),   # megacore split on v7x
            vmem_limit_bytes=vmem_limit,
        ),
    )(x, w8, bias_s)

    # Lane-dense (grid_steps, 1, TB) slab -> (B, 1).
    return out.reshape(grid_steps * TB)[:B].reshape(B, 1)


if __name__ == "__main__":
    key = jax.random.PRNGKey(0)
    kx, kw, kb, kx2 = jax.random.split(key, 4)

    input_dim = 32

    # Deterministic init mimicking nn.Linear's uniform(-1/sqrt(D), 1/sqrt(D)).
    bound = 1.0 / math.sqrt(input_dim)
    weight = jax.random.uniform(kw, (1, input_dim), jnp.float32, -bound, bound)
    bias = jax.random.uniform(kb, (1,), jnp.float32, -bound, bound)

    # Test 1: f32, auto tile sizing (>=2 grid steps, lane-dense output slab).
    batch = 256
    x = jax.random.normal(kx, (batch, input_dim), jnp.float32)
    out = jax.block_until_ready(linear_classifier(x, weight, bias))
    ref = x @ weight.T + bias
    assert out.shape == (batch, 1)
    assert jnp.allclose(out, ref, atol=1e-4, rtol=1e-4), float(jnp.max(jnp.abs(out - ref)))

    # Test 2: multi-tile grid with a ragged final tile (exercises pipelining
    # and the padded-slab -> (B, 1) slice path).
    batch2 = 300
    x2 = jax.random.normal(kx2, (batch2, input_dim), jnp.float32)
    out2 = jax.block_until_ready(
        linear_classifier(x2, weight, bias, block_batch=128))
    ref2 = x2 @ weight.T + bias
    assert out2.shape == (batch2, 1)
    assert jnp.allclose(out2, ref2, atol=1e-4, rtol=1e-4), float(jnp.max(jnp.abs(out2 - ref2)))

    # Test 3: bf16 inputs stay bf16 on the MXU (f32 accumulation, no upcast).
    xb = x.astype(jnp.bfloat16)
    wb = weight.astype(jnp.bfloat16)
    outb = jax.block_until_ready(linear_classifier(xb, wb, bias))
    refb = xb.astype(jnp.float32) @ wb.astype(jnp.float32).T + bias
    assert outb.shape == (batch, 1)
    assert jnp.allclose(outb.astype(jnp.float32), refb, atol=3e-2, rtol=3e-2)

    print("KERNEL_OK")
</pallas_src>

<mosaic_0001>
module attributes {stable_mosaic.version = 11 : i64} {
  func.func @_linear_kernel(%arg0: i32, %arg1: memref<128x32xf32, #tpu.memory_space<vmem>>, %arg2: memref<8x32xf32, #tpu.memory_space<vmem>>, %arg3: memref<1xf32, #tpu.memory_space<smem>>, %arg4: memref<1x1x128xf32, #tpu.memory_space<vmem>>) attributes {dimension_semantics = [#tpu.dimension_semantics<parallel>], iteration_bounds = array<i64: 2>, scalar_prefetch = 0 : i64, scratch_operands = 0 : i64, tpu.core_type = #tpu.core_type<tc>, window_params = [{transform_indices = @transform_0, window_bounds = array<i64: 128, 32>}, {pipeline_mode = #tpu.pipeline_mode<synchronous>, transform_indices = @transform_1, window_bounds = array<i64: 8, 32>}, {transform_indices = @transform_2, window_bounds = array<i64: 1>}, {transform_indices = @transform_3, window_bounds = array<i64: 1, 1, 128>}]} {
    %c0 = arith.constant 0 : index
    %c0_0 = arith.constant 0 : index
    %0 = vector.load %arg2[%c0, %c0_0] : memref<8x32xf32, #tpu.memory_space<vmem>>, vector<8x32xf32>
    %c0_1 = arith.constant 0 : index
    %c0_2 = arith.constant 0 : index
    %1 = vector.load %arg1[%c0_1, %c0_2] : memref<128x32xf32, #tpu.memory_space<vmem>>, vector<128x32xf32>
    %cst = arith.constant dense<0.000000e+00> : vector<8x128xf32>
    %2 = tpu.matmul %0, %1, %cst {dimension_numbers = #tpu.dot_dimension_numbers<[1], [1], [0], [0], [0, 0, 1, 0], [], []>} : vector<8x32xf32>, vector<128x32xf32>, vector<8x128xf32> -> vector<8x128xf32>
    %3 = vector.extract_strided_slice %2 {offsets = [0, 0], sizes = [1, 128], strides = [1, 1]} : vector<8x128xf32> to vector<1x128xf32>
    %c0_3 = arith.constant 0 : index
    %4 = memref.load %arg3[%c0_3] : memref<1xf32, #tpu.memory_space<smem>>
    %5 = vector.broadcast %4 : f32 to vector<1x128xf32>
    %6 = arith.addf %3, %5 : vector<1x128xf32>
    %7 = vector.shape_cast %6 : vector<1x128xf32> to vector<1x1x128xf32>
    %c0_4 = arith.constant 0 : index
    %c0_5 = arith.constant 0 : index
    %c0_6 = arith.constant 0 : index
    %8 = vector.load %arg4[%c0_4, %c0_5, %c0_6] : memref<1x1x128xf32, #tpu.memory_space<vmem>>, vector<1x1x128xf32>
    tpu.vector_store %arg4[%c0_4, %c0_5, %c0_6], %7 {strides = array<i32>} : memref<1x1x128xf32, #tpu.memory_space<vmem>>, vector<1x1x128xf32>,
    return
  }
  func.func @transform_0(%arg0: i32) -> (i32, i32) {
    %c0_i32 = arith.constant 0 : i32
    %c0_i32_0 = arith.constant 0 : i32
    return %arg0, %c0_i32 : i32, i32
  }
  func.func @transform_1(%arg0: i32) -> (i32, i32) {
    %c0_i32 = arith.constant 0 : i32
    %c0_i32_0 = arith.constant 0 : i32
    %c0_i32_1 = arith.constant 0 : i32
    return %c0_i32, %c0_i32_0 : i32, i32
  }
  func.func @transform_2(%arg0: i32) -> i32 {
    %c0_i32 = arith.constant 0 : i32
    %c0_i32_0 = arith.constant 0 : i32
    return %c0_i32 : i32
  }
  func.func @transform_3(%arg0: i32) -> (i32, i32, i32) {
    %c0_i32 = arith.constant 0 : i32
    %c0_i32_0 = arith.constant 0 : i32
    %c0_i32_1 = arith.constant 0 : i32
    return %arg0, %c0_i32, %c0_i32_0 : i32, i32, i32
  }
}

</mosaic_0001>

<bundles_post_ra>
// kernel: tpu_custom_call.1
= control target key start
LH: loop header
LB: loop body
LE: loop exit
PB: predicated region body
PF: predicated region fallthrough
CT: control target
= control target key end

     0   :  { %s719_s0 = inlined_call_operand.vmem [shape: f32[256,32], index: 0, kind: input, shape index: {}]   ;;  %s720_s1 = inlined_call_operand.vmem [shape: f32[8,32], index: 1, kind: input, shape index: {}]   ;;  %s721_s2 = inlined_call_operand.<no memory space> [shape: f32[1], index: 2, kind: input, shape index: {}]   ;;  %s722_s3 = inlined_call_operand.hbm [shape: f32[2,1,128], index: 3, kind: output, shape index: {}]  }
   0x1   :  { %8 = sst [smem:[#allocation2]] %s721_s2 }
   0x2   :  { %9 = vsyncpa [#allocation4], 0 }
   0x3   :  { %11 = vsyncpa [#allocation4 + $0x1], 0  ;;  %s589_s14 = smov 0   ;;  %s591_s15 = smov 0  }
   0x4   :  { %s593_s16 = smov 0   ;;  %s595_s17 = smov 0  }
   0x5 LB: > { %s381_s2 = sadd.s32 4294967295, %s561_s17   ;;  %s382_s18 = sadd.s32 4294967294, %s561_s17   ;;  %s561_s17 = sphi %s595_s17, %s728_s17   ;;  %s557_s16 = sphi %s593_s16, %s727_s16   ;;  %s553_s15 = sphi %s591_s15, %s726_s15   ;;  %s549_s14 = sphi %s589_s14, %s725_s14  }
   0x6   : > { %s612_s19 = sadd.s32 1, %s561_s17   ;;  %s92_s20 = sadd.s32 1, %s557_s16 }
   0x7   : > { %s89_s21 = ssub.s32 %s561_s17, %s612_s19  ;;  %p102_p0 = scmp.ne.s32.totalorder %s557_s16, %s553_s15 }
   0x8   : > { %p90_p1 = scmp.eq.s32.totalorder %s89_s21, 0  ;;  %p103_p2 = scmp.eq.s32.totalorder %s381_s2, 1 }
   0x9   : > { %p108_p3 = scmp.ne.s32.totalorder %s553_s15, %s549_s14  ;;  %p109_p4 = scmp.eq.s32.totalorder %s382_s18, 1 }
   0xa   : > { %s622_s22 = scalar_select %p90_p1, %s557_s16, %s92_s20  }
   0xb   : > { %p624_p5 = por %p103_p2, %p102_p0  ;;  %p628_p6 = por %p109_p4, %p108_p3 }
   0xc   : > { %p385_p7 = scmp.ge.s32.totalorder %s561_s17, 1  ;;  %p142_p8 = scmp.lt.s32.totalorder %s561_s17, 3 }
   0xe   : > { %p143_p9 = pnand %p385_p7, %p142_p8 }
   0xf   : > { %s634_s25 = sshll.u32 (!%p143_p9), %s381_s2, 4  ;;  %s310_s6 = sld [smem:[#allocation2]] (!%p143_p9) }
  0x10   : > { %146 = sbr.rel (%p143_p9) target bundleno = 297 (0x129), region = 32  ;;  %p166_p10 = scmp.lt.s32.totalorder (!%p143_p9), %s634_s25, 31 }
  0x11   : > { %s163_s7 = sand.u32 (!%p143_p9), 1, %s553_s15   ;;  %s684_s12 = scalar_lea.hbm (!%p143_p9), %s722_s3, %s634_s25 }
  0x12   : > { %s164_s8 = scalar_lea.vmem (!%p143_p9), [#allocation3], %s163_s7  ;;  %s315_s13 = scalar_lea.sflag (!%p143_p9), [#allocation4], %s163_s7 }
  0x13   : > { %s327_s9 = sshll.u32 (!%p143_p9), %s164_s8, 4  ;;  %s565_s18 = smov (!%p143_p9), [#allocation3]   ;;  %s328_s9 = int_to_ptr.vmem [resolvable:$true] %s327_s9 }
  0x14   : > { %s501_s2 = scalar_lea.vmem (!%p143_p9), %s328_s9, 16  ;;  %s505_s20 = sshll.u32 (!%p143_p9), %s565_s18, 4  ;;  %s506_s20 = int_to_ptr.vmem [resolvable:$false] %s505_s20 }
  0x15   : > { %v563_v0 = vmov 0.0   ;;  %vm564_vm0 = vmmov 0   ;;  %s167_s26 = scalar_select %p166_p10, %s634_s25, 31  ;;  %vm188_vm1 = vcmask 261120   ;;  %v171_v17 = vld [vmem:[%s720_s1] sm:$0xff]  ;;  %v311_v18 = vstv %s310_s6 }
  0x16   : > { %425 = vmatprep.subr.mxu0 %v563_v0  ;;  %457 = vmatprep.mubr.msk.f32.mxu0 %vm564_vm0, %v563_v0  ;;  %p502_p11 = scmp.ne.s32.totalorder %s328_s9, %s501_s2  ;;  %s507_s21 = scalar_lea.vmem %s506_s20, 32 }
  0x17   : > { %s387_s27 = sshll.u32 %s167_s26, 3  ;;  %p508_p0 = scmp.lt.s32.totalorder %s328_s9, %s506_s20 }
  0x18   : > { %s641_s30 = scalar_lea.vmem %s719_s0, %s387_s27  ;;  %p503_p12 = pnand %p502_p11, %p624_p5 }
  0x19   : > { %v187_v1 = vld [vmem:[%s641_s30 + $0x78] sm:$0xff]  ;;  %v186_v2 = vld [vmem:[%s641_s30 + $0x70] sm:$0xff]  ;;  %v185_v3 = vld [vmem:[%s641_s30 + $0x68] sm:$0xff]  ;;  %p509_p1 = scmp.lt.s32.totalorder %s507_s21, %s501_s2 }
  0x1a   : > { %426 = vmatpush3.xpose.msk.msra.mxu0 %vm188_vm1, %v187_v1  ;;  %v184_v4 = vld [vmem:[%s641_s30 + $0x60] sm:$0xff]  ;;  %v183_v5 = vld [vmem:[%s641_s30 + $0x58] sm:$0xff]  ;;  %v182_v6 = vld [vmem:[%s641_s30 + $0x50] sm:$0xff]  ;;  %p504_p13 = pneg %p503_p12 }
  0x1b   : > { %427 = vmatprep.subr.mxu0 %v563_v0  ;;  %v181_v7 = vld [vmem:[%s641_s30 + $0x48] sm:$0xff]  ;;  %v180_v8 = vld [vmem:[%s641_s30 + $0x40] sm:$0xff]  ;;  %v179_v9 = vld [vmem:[%s641_s30 + $0x38] sm:$0xff]  ;;  %p510_p2 = por %p509_p1, %p508_p0 }
  0x1c   : > { %v178_v10 = vld [vmem:[%s641_s30 + $0x30] sm:$0xff]  ;;  %v177_v11 = vld [vmem:[%s641_s30 + $0x28] sm:$0xff]  ;;  %v176_v12 = vld [vmem:[%s641_s30 + $0x20] sm:$0xff] }
  0x1d   : > { %v175_v13 = vld [vmem:[%s641_s30 + $0x18] sm:$0xff]  ;;  %v174_v14 = vld [vmem:[%s641_s30 + $0x10] sm:$0xff]  ;;  %v173_v15 = vld [vmem:[%s641_s30 + $0x8] sm:$0xff]  ;;  %p511_p3 = pnand %p510_p2, %p504_p13 }
  0x1e   : > { %428 = vmatpush3.xpose.msk.msra.mxu0 %vm188_vm1, %v186_v2  ;;  %v172_v16 = vld [vmem:[%s641_s30] sm:$0xff] }
  0x1f   : > { %429 = vmatprep.subr.mxu0 %v563_v0 }
  0x22   : > { %430 = vmatpush3.xpose.msk.msra.mxu0 %vm188_vm1, %v185_v3 }
  0x23   : > { %431 = vmatprep.subr.mxu0 %v563_v0 }
  0x26   : > { %432 = vmatpush3.xpose.msk.msra.mxu0 %vm188_vm1, %v184_v4 }
  0x27   : > { %433 = vmatprep.subr.mxu0 %v563_v0 }
  0x2a   : > { %434 = vmatpush3.xpose.msk.msra.mxu0 %vm188_vm1, %v183_v5 }
  0x2b   : > { %435 = vmatprep.subr.mxu0 %v563_v0 }
  0x2e   : > { %436 = vmatpush3.xpose.msk.msra.mxu0 %vm188_vm1, %v182_v6 }
  0x2f   : > { %437 = vmatprep.subr.mxu0 %v563_v0 }
  0x32   : > { %438 = vmatpush3.xpose.msk.msra.mxu0 %vm188_vm1, %v181_v7 }
  0x33   : > { %439 = vmatprep.subr.mxu0 %v563_v0 }
  0x36   : > { %440 = vmatpush3.xpose.msk.msra.mxu0 %vm188_vm1, %v180_v8 }
  0x37   : > { %441 = vmatprep.subr.mxu0 %v563_v0 }
  0x3a   : > { %442 = vmatpush3.xpose.msk.msra.mxu0 %vm188_vm1, %v179_v9 }
  0x3b   : > { %443 = vmatprep.subr.mxu0 %v563_v0 }
  0x3e   : > { %444 = vmatpush3.xpose.msk.msra.mxu0 %vm188_vm1, %v178_v10 }
  0x3f   : > { %445 = vmatprep.subr.mxu0 %v563_v0 }
  0x42   : > { %446 = vmatpush3.xpose.msk.msra.mxu0 %vm188_vm1, %v177_v11 }
  0x43   : > { %447 = vmatprep.subr.mxu0 %v563_v0 }
  0x46   : > { %448 = vmatpush3.xpose.msk.msra.mxu0 %vm188_vm1, %v176_v12 }
  0x47   : > { %449 = vmatprep.subr.mxu0 %v563_v0 }
  0x4a   : > { %450 = vmatpush3.xpose.msk.msra.mxu0 %vm188_vm1, %v175_v13 }
  0x4b   : > { %451 = vmatprep.subr.mxu0 %v563_v0 }
  0x4e   : > { %452 = vmatpush3.xpose.msk.msra.mxu0 %vm188_vm1, %v174_v14 }
  0x4f   : > { %453 = vmatprep.subr.mxu0 %v563_v0 }
  0x52   : > { %454 = vmatpush3.xpose.msk.msra.mxu0 %vm188_vm1, %v173_v15 }
  0x53   : > { %455 = vmatprep.subr.mxu0 %v563_v0 }
  0x56   : > { %456 = vmatpush3.xpose.msk.msra.mxu0 %vm188_vm1, %v172_v16 }
  0x59   : > { %458 = vmatmul.mubr.msk.f32.vlgmr.msra.gmra.mxu0 %vm188_vm1, %v171_v17 }
 0x119   : > { %v306_v19 = vpop.f32.mrf.mxu0 }
 0x11a   : > { %v312_v20 = vadd.f32 %v311_v18, %v306_v19 }
 0x11b   : > { %v459_v21 = vpop.f32.mrf.mxu0 }
 0x11c   : > { %313 = vst [vmem:[%s164_s8] sm:$0x1] %v312_v20 }
 0x11d   : > { %514 = shalt.err (!%p511_p3)
}
 0x11e   : > { %s515_s25 = scalar_lea.hbm %s684_s12, 16  ;;  %s519_s28 = scalar_lea.hbm %s722_s3, 32 }
 0x11f   : > { %p516_p4 = scmp.ne.s32.totalorder %s684_s12, %s515_s25  ;;  %p520_p9 = scmp.lt.s32.totalorder %s684_s12, %s722_s3 }
 0x120   : > { %p521_p10 = scmp.lt.s32.totalorder %s519_s28, %s515_s25 }
 0x121   : > { %p517_p7 = pnand %p516_p4, %p624_p5 }
 0x122   : > { %p522_p11 = por %p521_p10, %p520_p9 }
 0x123   : > { %p518_p8 = pneg %p517_p7 }
 0x125   : > { %p523_p12 = pnand %p522_p11, %p518_p8 }
 0x127   : > { %526 = shalt.err (!%p523_p12)
}
 0x128   : > { %460 = dma.vmem_to_hbm [thread:$0]  (%p624_p5), %s328_s9, 16, %s684_s12, %s315_s13  }
 0x129 PF: > { %p466_p13 = scmp.ge.s32.totalorder %s561_s17, 2  ;;  %s339_s4 = sand.u32 1, %s549_s14  }
 0x12a   : > { %s340_s5 = scalar_lea.sflag [#allocation4], %s339_s4 }
 0x12b   : > { %p463_p0 = pnand %p466_p13, %p628_p6 }
 0x12d   : > { %p464_p1 = pneg %p463_p0 }
 0x12f   : > { %544 = dma.done.wait (%p464_p1), %s340_s5, 16  }
 0x130   : > { %546 = vsyncadd (%p464_p1), %s340_s5, 4294967280  ;;  %p14_p2 = scmp.ge.s32.totalorder %s612_s19, 4   ;;  %s725_s14 = smov %s553_s15 }
 0x131   : > { %s726_s15 = smov %s557_s16  ;;  %s727_s16 = smov %s622_s22 }
 0x132   : > { %s728_s17 = smov %s612_s19  ;;  %16 = sbr.rel (!%p14_p2) target bundleno = 5 (0x5), region = 67 }
 0x137   :  { %344 = vsyncpa [#allocation4], 1 }
 0x138   :  { %346 = vsyncpa [#allocation4 + $0x1], 1 }

</bundles_post_ra>
